<compile_context>
chip_gen: v7x
topology: tpu7x:2x2x1
jax: 0.10.0
libtpu: 0.0.40
codegen_flags: <defaults>
</compile_context>

<pallas_src>
import jax
import jax.numpy as jnp
from jax.experimental import pallas as pl
from jax.experimental.pallas import tpu as pltpu


def _round_up(a, b):
    return (a + b - 1) // b * b


def _soft_dice_sums_kernel(x_ref, y_ref, tp_ref, s_ref):
    """Accumulate per-row sum(x*y) and sum(x+y) across the HW (lane) grid axis."""
    k = pl.program_id(1)

    @pl.when(k == 0)
    def _init():
        tp_ref[...] = jnp.zeros_like(tp_ref)
        s_ref[...] = jnp.zeros_like(s_ref)

    x = x_ref[...].astype(jnp.float32)
    y = y_ref[...].astype(jnp.float32)

    # tp            = sum(x * y)
    # 2*tp + fp + fn = sum(x) + sum(y) = sum(x + y)
    tp_ref[...] += jnp.sum(x * y, axis=-1, keepdims=True)
    s_ref[...] += jnp.sum(x + y, axis=-1, keepdims=True)


def soft_dice_loss(x, y, smooth=1.0, *, target_block_bytes=2 * 1024 * 1024):
    """Pallas implementation of SoftDiceLoss(smooth, dims=(-2, -1)) for NCHW inputs."""
    assert x.shape == y.shape
    N, C, H, W = x.shape
    nc, hw = N * C, H * W
    itemsize = jnp.dtype(x.dtype).itemsize

    # ---- tile selection: (8, 128)-aligned, lane-dense, VMEM-budgeted --------
    nc8 = _round_up(nc, 8)
    hw128 = _round_up(hw, 128)
    tile_nc = min(nc8, 512)  # multiple of 8
    max_hw = max(128, (target_block_bytes // (tile_nc * itemsize)) // 128 * 128)
    tile_hw = min(hw128, max_hw)

    nc_pad = _round_up(nc, tile_nc)
    hw_pad = _round_up(hw, tile_hw)

    # ---- flatten + zero-pad (zeros contribute 0 to both accumulated sums) ---
    xr = jnp.reshape(x, (nc, hw))
    yr = jnp.reshape(y, (nc, hw))
    if (nc_pad, hw_pad) != (nc, hw):
        xr = jnp.pad(xr, ((0, nc_pad - nc), (0, hw_pad - hw)))
        yr = jnp.pad(yr, ((0, nc_pad - nc), (0, hw_pad - hw)))

    grid = (nc_pad // tile_nc, hw_pad // tile_hw)

    in_spec = pl.BlockSpec((tile_nc, tile_hw), lambda i, k: (i, k))
    out_spec = pl.BlockSpec((tile_nc, 1), lambda i, k: (i, 0))

    cost = pl.CostEstimate(
        flops=4 * nc_pad * hw_pad,
        transcendentals=0,
        bytes_accessed=2 * nc_pad * hw_pad * itemsize + 2 * nc_pad * 4,
    )

    tp, s = pl.pallas_call(
        _soft_dice_sums_kernel,
        out_shape=(
            jax.ShapeDtypeStruct((nc_pad, 1), jnp.float32),
            jax.ShapeDtypeStruct((nc_pad, 1), jnp.float32),
        ),
        grid_spec=pltpu.PrefetchScalarGridSpec(
            num_scalar_prefetch=0,
            grid=grid,
            in_specs=[in_spec, in_spec],
            out_specs=(out_spec, out_spec),
        ),
        compiler_params=pltpu.CompilerParams(
            dimension_semantics=("parallel", "arbitrary"),
            vmem_limit_bytes=32 * 1024 * 1024,
        ),
        cost_estimate=cost,
    )(xr, yr)

    # Tiny finalize in the wrapper; padded rows are sliced off before the mean.
    tp = tp[:nc, 0]
    s = s[:nc, 0]
    smooth = jnp.float32(smooth)
    dc = (2.0 * tp + smooth) / (s + smooth)
    return (1.0 - jnp.mean(dc)).astype(jnp.float32)


def soft_dice_loss_ref(x, y, smooth=1.0, dims=(-2, -1)):
    # Pure-JAX reference, mirrors the PyTorch module exactly.
    tp = (x * y).sum(dims)
    fp = (x * (1.0 - y)).sum(dims)
    fn = ((1.0 - x) * y).sum(dims)
    dc = (2.0 * tp + smooth) / (2.0 * tp + fp + fn + smooth)
    return 1.0 - dc.mean()


if __name__ == "__main__":
    key = jax.random.PRNGKey(0)
    kx, ky = jax.random.split(key)

    N, C, H, W = 2, 4, 16, 16
    # x: soft predictions in [0, 1]; y: binary targets as float (like PyTorch use).
    x = jax.nn.sigmoid(jax.random.normal(kx, (N, C, H, W), dtype=jnp.float32))
    y = (jax.random.uniform(ky, (N, C, H, W)) > 0.5).astype(jnp.float32)

    loss = jax.block_until_ready(soft_dice_loss(x, y, smooth=1.0))
    ref = jax.block_until_ready(soft_dice_loss_ref(x, y, smooth=1.0))

    assert jnp.allclose(loss, ref, atol=1e-5, rtol=1e-5), (loss, ref)
    print("KERNEL_OK")
</pallas_src>

<mosaic_0001>
module attributes {stable_mosaic.version = 11 : i64} {
  func.func @_soft_dice_sums_kernel(%arg0: i32, %arg1: i32, %arg2: memref<8x256xf32, #tpu.memory_space<vmem>>, %arg3: memref<8x256xf32, #tpu.memory_space<vmem>>, %arg4: memref<8x1xf32, #tpu.memory_space<vmem>>, %arg5: memref<8x1xf32, #tpu.memory_space<vmem>>) attributes {dimension_semantics = [#tpu.dimension_semantics<parallel>, #tpu.dimension_semantics<arbitrary>], iteration_bounds = array<i64: 1, 1>, scalar_prefetch = 0 : i64, scratch_operands = 0 : i64, tpu.core_type = #tpu.core_type<tc>, window_params = [{transform_indices = @transform_0, window_bounds = array<i64: 8, 256>}, {transform_indices = @transform_1, window_bounds = array<i64: 8, 256>}, {transform_indices = @transform_2, window_bounds = array<i64: 8, 1>}, {transform_indices = @transform_3, window_bounds = array<i64: 8, 1>}]} {
    %c0_i32 = arith.constant 0 : i32
    %0 = arith.cmpi eq, %arg1, %c0_i32 : i32
    %1 = arith.extui %0 : i1 to i32
    %c0_i32_0 = arith.constant 0 : i32
    %2 = arith.cmpi ne, %1, %c0_i32_0 : i32
    scf.if %2 {
      %cst_13 = arith.constant 0.000000e+00 : f32
      %17 = vector.broadcast %cst_13 : f32 to vector<8x1xf32>
      %c0_14 = arith.constant 0 : index
      %c0_15 = arith.constant 0 : index
      %18 = vector.load %arg4[%c0_14, %c0_15] : memref<8x1xf32, #tpu.memory_space<vmem>>, vector<8x1xf32>
      tpu.vector_store %arg4[%c0_14, %c0_15], %17 {strides = array<i32>} : memref<8x1xf32, #tpu.memory_space<vmem>>, vector<8x1xf32>,
      %cst_16 = arith.constant 0.000000e+00 : f32
      %19 = vector.broadcast %cst_16 : f32 to vector<8x1xf32>
      %c0_17 = arith.constant 0 : index
      %c0_18 = arith.constant 0 : index
      %20 = vector.load %arg5[%c0_17, %c0_18] : memref<8x1xf32, #tpu.memory_space<vmem>>, vector<8x1xf32>
      tpu.vector_store %arg5[%c0_17, %c0_18], %19 {strides = array<i32>} : memref<8x1xf32, #tpu.memory_space<vmem>>, vector<8x1xf32>,
    } else {
    }
    %c0 = arith.constant 0 : index
    %c0_1 = arith.constant 0 : index
    %3 = vector.load %arg2[%c0, %c0_1] : memref<8x256xf32, #tpu.memory_space<vmem>>, vector<8x256xf32>
    %c0_2 = arith.constant 0 : index
    %c0_3 = arith.constant 0 : index
    %4 = vector.load %arg3[%c0_2, %c0_3] : memref<8x256xf32, #tpu.memory_space<vmem>>, vector<8x256xf32>
    %c0_4 = arith.constant 0 : index
    %c0_5 = arith.constant 0 : index
    %5 = vector.load %arg4[%c0_4, %c0_5] : memref<8x1xf32, #tpu.memory_space<vmem>>, vector<8x1xf32>
    %6 = arith.mulf %3, %4 : vector<8x256xf32>
    %cst = arith.constant dense<0.000000e+00> : vector<8xf32>
    %7 = vector.multi_reduction <add>, %6, %cst [1] : vector<8x256xf32> to vector<8xf32>
    %8 = vector.shape_cast %7 : vector<8xf32> to vector<8x1xf32>
    %9 = arith.addf %5, %8 : vector<8x1xf32>
    %c0_6 = arith.constant 0 : index
    %c0_7 = arith.constant 0 : index
    %10 = vector.load %arg4[%c0_6, %c0_7] : memref<8x1xf32, #tpu.memory_space<vmem>>, vector<8x1xf32>
    tpu.vector_store %arg4[%c0_6, %c0_7], %9 {strides = array<i32>} : memref<8x1xf32, #tpu.memory_space<vmem>>, vector<8x1xf32>,
    %c0_8 = arith.constant 0 : index
    %c0_9 = arith.constant 0 : index
    %11 = vector.load %arg5[%c0_8, %c0_9] : memref<8x1xf32, #tpu.memory_space<vmem>>, vector<8x1xf32>
    %12 = arith.addf %3, %4 : vector<8x256xf32>
    %cst_10 = arith.constant dense<0.000000e+00> : vector<8xf32>
    %13 = vector.multi_reduction <add>, %12, %cst_10 [1] : vector<8x256xf32> to vector<8xf32>
    %14 = vector.shape_cast %13 : vector<8xf32> to vector<8x1xf32>
    %15 = arith.addf %11, %14 : vector<8x1xf32>
    %c0_11 = arith.constant 0 : index
    %c0_12 = arith.constant 0 : index
    %16 = vector.load %arg5[%c0_11, %c0_12] : memref<8x1xf32, #tpu.memory_space<vmem>>, vector<8x1xf32>
    tpu.vector_store %arg5[%c0_11, %c0_12], %15 {strides = array<i32>} : memref<8x1xf32, #tpu.memory_space<vmem>>, vector<8x1xf32>,
    return
  }
  func.func @transform_0(%arg0: i32, %arg1: i32) -> (i32, i32) {
    %c0_i32 = arith.constant 0 : i32
    return %arg0, %arg1 : i32, i32
  }
  func.func @transform_1(%arg0: i32, %arg1: i32) -> (i32, i32) {
    %c0_i32 = arith.constant 0 : i32
    return %arg0, %arg1 : i32, i32
  }
  func.func @transform_2(%arg0: i32, %arg1: i32) -> (i32, i32) {
    %c0_i32 = arith.constant 0 : i32
    %c0_i32_0 = arith.constant 0 : i32
    return %arg0, %c0_i32 : i32, i32
  }
  func.func @transform_3(%arg0: i32, %arg1: i32) -> (i32, i32) {
    %c0_i32 = arith.constant 0 : i32
    %c0_i32_0 = arith.constant 0 : i32
    return %arg0, %c0_i32 : i32, i32
  }
}

</mosaic_0001>

<bundles_post_ra>
// kernel: tpu_custom_call.1
= control target key start
LH: loop header
LB: loop body
LE: loop exit
PB: predicated region body
PF: predicated region fallthrough
CT: control target
= control target key end

     0   :  { %9 = vsyncpa [#allocation3], 0  ;;  %s195_s0 = inlined_call_operand.hbm [shape: f32[8,256], index: 0, kind: input, shape index: {}]   ;;  %s196_s1 = inlined_call_operand.hbm [shape: f32[8,256], index: 1, kind: input, shape index: {}]   ;;  %s197_s2 = inlined_call_operand.vmem [shape: f32[8,1], index: 2, kind: output, shape index: {0}]   ;;  %s198_s3 = inlined_call_operand.vmem [shape: f32[8,1], index: 3, kind: output, shape index: {1}]  }
   0x1   :  { %10 = vsyncpa [#allocation5], 0  ;;  %s126_s12 = smov [#allocation2]   ;;  %s127_s14 = smov [#allocation4]  }
   0x2   :  { %s17_s13 = sshll.u32 %s126_s12, 4  ;;  %s27_s15 = sshll.u32 %s127_s14, 4  ;;  %s18_s13 = int_to_ptr.vmem [resolvable:$true] %s17_s13  ;;  %s28_s15 = int_to_ptr.vmem [resolvable:$true] %s27_s15 }
   0x3   :  { %s78_s18 = scalar_lea.hbm %s195_s0, 256 }
   0x4   :  { %p79_p0 = scmp.ne.s32.totalorder %s195_s0, %s78_s18  ;;  %p82_p1 = scmp.lt.u32.totalorder %s78_s18, %s195_s0 }
   0x6   :  { %p84_p2 = pnand %p82_p1, %p79_p0 }
   0x8   :  { %87 = shalt.err (!%p84_p2)
}
   0x9   :  { %s88_s23 = scalar_lea.vmem %s18_s13, 256  ;;  %p93_p4 = scmp.lt.s32.totalorder %s18_s13, %s18_s13 }
   0xa   :  { %p89_p3 = scmp.ne.s32.totalorder %s18_s13, %s88_s23  ;;  %p94_p5 = scmp.lt.s32.totalorder %s88_s23, %s88_s23 }
   0xc   :  { %p95_p6 = por %p94_p5, %p93_p4 }
   0xe   :  { %p96_p7 = pnand %p95_p6, %p89_p3 }
  0x10   :  { %99 = shalt.err (!%p96_p7)
}
  0x11   :  { %20 = dma.hbm_to_vmem [thread:$0]  %s195_s0, 256, %s18_s13, [#allocation3]  }
  0x12   :  { %s100_s28 = scalar_lea.hbm %s196_s1, 256 }
  0x13   :  { %p101_p8 = scmp.ne.s32.totalorder %s196_s1, %s100_s28  ;;  %p104_p9 = scmp.lt.u32.totalorder %s100_s28, %s196_s1 }
  0x15   :  { %p106_p10 = pnand %p104_p9, %p101_p8 }
  0x17   :  { %109 = shalt.err (!%p106_p10)
}
  0x18   :  { %s110_s6 = scalar_lea.vmem %s28_s15, 256  ;;  %p115_p12 = scmp.lt.s32.totalorder %s28_s15, %s28_s15 }
  0x19   :  { %p111_p11 = scmp.ne.s32.totalorder %s28_s15, %s110_s6  ;;  %p116_p13 = scmp.lt.s32.totalorder %s110_s6, %s110_s6 }
  0x1b   :  { %p117_p0 = por %p116_p13, %p115_p12 }
  0x1d   :  { %p118_p1 = pnand %p117_p0, %p111_p11 }
  0x1f   :  { %121 = shalt.err (!%p118_p1)
}
  0x20   :  { %30 = dma.hbm_to_vmem [thread:$0]  %s196_s1, 256, %s28_s15, [#allocation5]  }
  0x21   :  { %122 = dma.done.wait [#allocation3], 256  }
  0x22   :  { %123 = vsyncadd [#allocation3], 4294967040 }
  0x23   :  { %124 = dma.done.wait [#allocation5], 256  }
  0x24   :  { %125 = vsyncadd [#allocation5], 4294967040  ;;  %vm41_vm0 = vcmask 7168   ;;  %v128_v0 = vmov 0.0   ;;  %v44_v1 = vld [vmem:[#allocation2] sm:$0xff]  ;;  %v45_v2 = vld [vmem:[#allocation2 + $0x8] sm:$0xff] }
  0x25   :  { %42 = vst.msk [vmem:[%s197_s2] sm:$0xff] %vm41_vm0, %v128_v0  ;;  %43 = vst.msk [vmem:[%s198_s3] sm:$0xff] %vm41_vm0, %v128_v0  ;;  %v46_v3 = vld [vmem:[#allocation4] sm:$0xff]  ;;  %v47_v4 = vld [vmem:[#allocation4 + $0x8] sm:$0xff] }
  0x26   :  { %v49_v5 = vmul.f32 %v46_v3, %v44_v1  ;;  %v50_v6 = vmul.f32 %v47_v4, %v45_v2  ;;  %v58_v7 = vadd.f32 %v46_v3, %v44_v1  ;;  %v59_v8 = vadd.f32 %v47_v4, %v45_v2 }
  0x28   :  { %v51_v9 = vadd.f32 %v50_v6, %v49_v5  ;;  %v60_v10 = vadd.f32 %v59_v8, %v58_v7 }
  0x2a   :  { %52 = vadd.xlane.f32.xlu0 %v51_v9 }
  0x2c   :  { %v48_v11 = vld [vmem:[%s197_s2] sm:$0xff] }
  0x2d   :  { %v57_v14 = vld [vmem:[%s198_s3] sm:$0xff] }
  0x2e   :  { %61 = vadd.xlane.f32.xlu0 %v60_v10 }
  0xb7   :  { %v53_v12 = vpop.xlane.xlu0 %52 }
  0xb8   :  { %v54_v13 = vadd.f32 %v53_v12, %v48_v11 }
  0xba   :  { %56 = vst.msk [vmem:[%s197_s2] sm:$0xff] %vm41_vm0, %v54_v13 }
  0xbb   :  { %v62_v15 = vpop.xlane.xlu0 %61 }
  0xbc   :  { %v63_v16 = vadd.f32 %v62_v15, %v57_v14 }
  0xbe   :  { %64 = vst.msk [vmem:[%s198_s3] sm:$0xff] %vm41_vm0, %v63_v16 }
  0xbf   :  { %73 = vsyncpa [#allocation3], 1 }
  0xc0   :  { %74 = vsyncpa [#allocation5], 1 }

</bundles_post_ra>
